<compile_context>
chip_gen: v7x
topology: tpu7x:2x2x1
jax: 0.10.0
libtpu: 0.0.40
codegen_flags: <defaults>
</compile_context>

<pallas_src>
import jax
import jax.numpy as jnp
from jax.experimental import pallas as pl
from jax.experimental.pallas import tpu as pltpu


# ----------------------------------------------------------------------------
# Helpers
# ----------------------------------------------------------------------------
def _round_up(x, m):
    return ((x + m - 1) // m) * m


def _largest_tile(dim, cap):
    """Largest multiple of 128 that divides `dim` (a multiple of 128), <= cap."""
    best = 128
    t = 256
    while t <= cap:
        if dim % t == 0:
            best = t
        t += 128
    return best


def _pick_tiles(M, Kp, Np):
    """Per-layer adaptive matmul tiles (Kp, Np are already multiples of 128)."""
    tm = min(512, _round_up(max(M, 1), 8))
    tk = _largest_tile(Kp, 1024)
    tn = _largest_tile(Np, 256)
    # Deep layers with a single (i, j) tile would leave v7x's second TensorCore
    # idle; split N so the parallel grid has >= 2 blocks.
    if _round_up(M, tm) // tm == 1 and Np // tn == 1 and Np >= 256:
        tn = 128
    return tm, tk, tn


# ----------------------------------------------------------------------------
# Pallas kernel 1a: tiled matmul with fused per-column bias (raw convs / heads)
# ----------------------------------------------------------------------------
def _matmul_bias_kernel(a_ref, b_ref, bias_ref, o_ref, acc_ref):
    @pl.when(pl.program_id(2) == 0)
    def _():
        acc_ref[...] = jnp.zeros_like(acc_ref)

    acc_ref[...] += jnp.dot(a_ref[...], b_ref[...],
                            preferred_element_type=jnp.float32)

    @pl.when(pl.program_id(2) == pl.num_programs(2) - 1)
    def _():
        o_ref[...] = (acc_ref[...] + bias_ref[...]).astype(o_ref.dtype)


def matmul_bias(a, wmat, bias, n_out):
    """a:(M,K) f32, wmat:(Kp,Np) bf16 pre-padded, bias:(1,Np) f32 -> (M,n_out)."""
    M, K = a.shape
    Kp, Np = wmat.shape
    tm, tk, tn = _pick_tiles(M, Kp, Np)
    Mp = _round_up(M, tm)
    a_p = jnp.pad(a, ((0, Mp - M), (0, Kp - K))).astype(jnp.bfloat16)
    grid = (Mp // tm, Np // tn, Kp // tk)

    out = pl.pallas_call(
        _matmul_bias_kernel,
        out_shape=jax.ShapeDtypeStruct((Mp, Np), jnp.float32),
        grid_spec=pltpu.PrefetchScalarGridSpec(
            num_scalar_prefetch=0,
            grid=grid,
            in_specs=[
                pl.BlockSpec((tm, tk), lambda i, j, k: (i, k)),
                pl.BlockSpec((tk, tn), lambda i, j, k: (k, j)),
                pl.BlockSpec((1, tn), lambda i, j, k: (0, j)),
            ],
            out_specs=pl.BlockSpec((tm, tn), lambda i, j, k: (i, j)),
            scratch_shapes=[pltpu.VMEM((tm, tn), jnp.float32)],
        ),
        compiler_params=pltpu.CompilerParams(
            dimension_semantics=("parallel", "parallel", "arbitrary")),
    )(a_p, wmat, bias)
    return out[:M, :n_out]


# ----------------------------------------------------------------------------
# Pallas kernel 1b: tiled matmul with fused BN-statistics epilogue (CBL convs)
# ----------------------------------------------------------------------------
def _matmul_stats_kernel(a_ref, b_ref, o_ref, sum_ref, sq_ref, acc_ref):
    @pl.when(pl.program_id(2) == 0)
    def _():
        acc_ref[...] = jnp.zeros_like(acc_ref)

    acc_ref[...] += jnp.dot(a_ref[...], b_ref[...],
                            preferred_element_type=jnp.float32)

    @pl.when(pl.program_id(2) == pl.num_programs(2) - 1)
    def _():
        acc = acc_ref[...]
        o_ref[...] = acc.astype(o_ref.dtype)
        # per-(i,j)-tile column sum / sum-of-squares, written into row 0 of an
        # 8-row (sublane-aligned) block; padded rows of A are zero so they do
        # not perturb the statistics.
        s = jnp.sum(acc, axis=0, keepdims=True)
        sq = jnp.sum(acc * acc, axis=0, keepdims=True)
        row = jax.lax.broadcasted_iota(jnp.int32, sum_ref.shape, 0)
        sum_ref[...] = jnp.where(row == 0, s, 0.0)
        sq_ref[...] = jnp.where(row == 0, sq, 0.0)


def matmul_stats(a, wmat, n_out):
    """Like matmul_bias (no bias) but also returns per-column sum / sum-sq."""
    M, K = a.shape
    Kp, Np = wmat.shape
    tm, tk, tn = _pick_tiles(M, Kp, Np)
    Mp = _round_up(M, tm)
    num_i = Mp // tm
    a_p = jnp.pad(a, ((0, Mp - M), (0, Kp - K))).astype(jnp.bfloat16)
    grid = (num_i, Np // tn, Kp // tk)

    y, psum, psq = pl.pallas_call(
        _matmul_stats_kernel,
        out_shape=(
            jax.ShapeDtypeStruct((Mp, Np), jnp.float32),
            jax.ShapeDtypeStruct((8 * num_i, Np), jnp.float32),
            jax.ShapeDtypeStruct((8 * num_i, Np), jnp.float32),
        ),
        grid_spec=pltpu.PrefetchScalarGridSpec(
            num_scalar_prefetch=0,
            grid=grid,
            in_specs=[
                pl.BlockSpec((tm, tk), lambda i, j, k: (i, k)),
                pl.BlockSpec((tk, tn), lambda i, j, k: (k, j)),
            ],
            out_specs=[
                pl.BlockSpec((tm, tn), lambda i, j, k: (i, j)),
                pl.BlockSpec((8, tn), lambda i, j, k: (i, j)),
                pl.BlockSpec((8, tn), lambda i, j, k: (i, j)),
            ],
            scratch_shapes=[pltpu.VMEM((tm, tn), jnp.float32)],
        ),
        compiler_params=pltpu.CompilerParams(
            dimension_semantics=("parallel", "parallel", "arbitrary")),
    )(a_p, wmat)

    col_sum = jnp.sum(psum, axis=0)[:n_out]
    col_sq = jnp.sum(psq, axis=0)[:n_out]
    return y[:M, :n_out], col_sum, col_sq


# ----------------------------------------------------------------------------
# Pallas kernel 2: BatchNorm(apply) + LeakyReLU(0.1) (+ optional residual add)
# ----------------------------------------------------------------------------
def _bn_lrelu_kernel(x_ref, scale_ref, shift_ref, o_ref):
    y = x_ref[...] * scale_ref[...] + shift_ref[...]
    o_ref[...] = jnp.where(y > 0, y, 0.1 * y)


def _bn_lrelu_add_kernel(x_ref, scale_ref, shift_ref, res_ref, o_ref):
    y = x_ref[...] * scale_ref[...] + shift_ref[...]
    y = jnp.where(y > 0, y, 0.1 * y)
    o_ref[...] = y + res_ref[...]


def _bn_lrelu_call(yf, scale, shift, rf):
    M, C = yf.shape
    tm = min(512, _round_up(M, 8))
    Mp = _round_up(M, tm)
    yp = jnp.pad(yf, ((0, Mp - M), (0, 0)))

    args = [yp, scale, shift]
    in_specs = [
        pl.BlockSpec((tm, C), lambda i: (i, 0)),
        pl.BlockSpec((1, C), lambda i: (0, 0)),
        pl.BlockSpec((1, C), lambda i: (0, 0)),
    ]
    kernel = _bn_lrelu_kernel
    if rf is not None:
        args.append(jnp.pad(rf, ((0, Mp - M), (0, 0))))
        in_specs.append(pl.BlockSpec((tm, C), lambda i: (i, 0)))
        kernel = _bn_lrelu_add_kernel

    out = pl.pallas_call(
        kernel,
        out_shape=jax.ShapeDtypeStruct((Mp, C), jnp.float32),
        grid=(Mp // tm,),
        in_specs=in_specs,
        out_specs=pl.BlockSpec((tm, C), lambda i: (i, 0)),
        compiler_params=pltpu.CompilerParams(
            dimension_semantics=("parallel",)),
    )(*args)
    return out[:M]


def _apply_bn_lrelu(yf, scale, shift, rf=None):
    """yf: (M, C) f32; scale/shift: (1, C).  Lane-dense reshape for small C."""
    M, C = yf.shape
    if C < 128 and 128 % C == 0 and (M * C) % 128 == 0:
        rep = 128 // C
        Mr = (M * C) // 128
        out = _bn_lrelu_call(
            yf.reshape(Mr, 128),
            jnp.tile(scale, (1, rep)),
            jnp.tile(shift, (1, rep)),
            None if rf is None else rf.reshape(Mr, 128),
        )
        return out.reshape(M, C)
    return _bn_lrelu_call(yf, scale, shift, rf)


# ----------------------------------------------------------------------------
# Convolution = im2col (glue) + Pallas matmul
# ----------------------------------------------------------------------------
def _im2col(x, kh, kw, stride, padding):
    """x: NHWC f32 -> (M, kh*kw*Cin) patch matrix plus output spatial shape."""
    N, H, W, Cin = x.shape
    if padding > 0:
        x = jnp.pad(x, ((0, 0), (padding, padding), (padding, padding), (0, 0)))
    Hp, Wp = x.shape[1], x.shape[2]
    oh = (Hp - kh) // stride + 1
    ow = (Wp - kw) // stride + 1
    if kh == 1 and kw == 1 and stride == 1:
        a = x.reshape(N * oh * ow, Cin)
    else:
        patches = []
        for dy in range(kh):
            for dx in range(kw):
                patches.append(
                    x[:, dy:dy + stride * oh:stride, dx:dx + stride * ow:stride, :])
        a = jnp.concatenate(patches, axis=-1).reshape(N * oh * ow, kh * kw * Cin)
    return a, (N, oh, ow)


def _conv_apply(x, prep, stride=1, padding=0):
    """Raw conv with bias (no BN / activation) -- conv1..conv4, tmps, heads."""
    a, (n, oh, ow) = _im2col(x, prep["kh"], prep["kw"], stride, padding)
    out = matmul_bias(a, prep["wmat"], prep["bias"], prep["cout"])
    return out.reshape(n, oh, ow, prep["cout"])


def _cbl_apply(x, prep, stride=1, padding=0, residual=None):
    """Conv (bias cancelled by BN) + training-mode BN + LeakyReLU(0.1)."""
    a, (n, oh, ow) = _im2col(x, prep["kh"], prep["kw"], stride, padding)
    cout = prep["cout"]
    y, col_sum, col_sq = matmul_stats(a, prep["wmat"], cout)
    M = n * oh * ow
    mean = col_sum / M
    var = jnp.maximum(col_sq / M - mean * mean, 0.0)   # biased, matches BN fwd
    inv = 1.0 / jnp.sqrt(var + 1e-5)
    scale = inv.reshape(1, cout)
    shift = (-mean * inv).reshape(1, cout)
    rf = None if residual is None else residual.reshape(-1, cout)
    out = _apply_bn_lrelu(y, scale, shift, rf)
    return out.reshape(n, oh, ow, cout)


# ----------------------------------------------------------------------------
# Parameter construction (deterministic synthetic init, PyTorch layout)
# ----------------------------------------------------------------------------
class _KeyGen:
    def __init__(self, seed):
        self._key = jax.random.PRNGKey(seed)

    def __call__(self):
        self._key, sub = jax.random.split(self._key)
        return sub


def _conv_params(key, cin, cout, k):
    kw_, kb_ = jax.random.split(key)
    fan_in = cin * k * k
    w = jax.random.normal(kw_, (cout, cin, k, k), jnp.float32) / jnp.sqrt(
        jnp.float32(fan_in))
    b = jax.random.normal(kb_, (cout,), jnp.float32) * 0.01
    return {"w": w, "b": b}


def make_yolov3_params(seed=0, in_channel=3, class_n=80):
    kg = _KeyGen(seed)

    def cbl(cin, cout, k):
        return _conv_params(kg(), cin, cout, k)

    def res_block(c):
        return {"c1": cbl(c, c // 2, 1), "c2": cbl(c // 2, c, 3)}

    def conv_block(cin, cmid, cbig):
        return [
            cbl(cin, cmid, 1), cbl(cmid, cbig, 3),
            cbl(cbig, cmid, 1), cbl(cmid, cbig, 3),
            cbl(cbig, cmid, 1), cbl(cmid, cbig, 3),
        ]

    out_ch = 3 * (4 + 1 + class_n)
    P = {}
    P["first1"] = cbl(in_channel, 32, 3)
    P["first2"] = cbl(32, 64, 3)
    P["rb1"] = [res_block(64)]
    P["conv1"] = _conv_params(kg(), 64, 128, 3)
    P["rb2"] = [res_block(128) for _ in range(2)]
    P["conv2"] = _conv_params(kg(), 128, 256, 3)
    P["rb3"] = [res_block(256) for _ in range(8)]
    P["conv3"] = _conv_params(kg(), 256, 512, 3)
    P["rb4"] = [res_block(512) for _ in range(8)]
    P["conv4"] = _conv_params(kg(), 512, 1024, 3)
    P["rb5"] = [res_block(1024) for _ in range(4)]
    P["convblock"] = conv_block(1024, 512, 1024)
    P["scale3_out"] = _conv_params(kg(), 1024, out_ch, 1)
    P["scale2_tmp"] = _conv_params(kg(), 1024, 256, 1)
    P["scale2_cb"] = conv_block(768, 256, 512)
    P["scale2_out"] = _conv_params(kg(), 512, out_ch, 1)
    P["scale1_tmp"] = _conv_params(kg(), 512, 128, 1)
    P["scale1_cb"] = conv_block(384, 128, 256)
    P["scale1_out"] = _conv_params(kg(), 256, out_ch, 1)
    return P


# ----------------------------------------------------------------------------
# One-time weight preparation: transpose -> (K, N), pad to 128-tiles, bf16.
# ----------------------------------------------------------------------------
def _prep_conv(p, use_bias):
    w = p["w"]
    cout, cin, kh, kw = w.shape
    K = kh * kw * cin
    Kp = _round_up(K, 128)
    Np = _round_up(cout, 128)
    wmat = jnp.transpose(w, (2, 3, 1, 0)).reshape(K, cout)
    wmat = jnp.pad(wmat, ((0, Kp - K), (0, Np - cout))).astype(jnp.bfloat16)
    out = {"wmat": wmat, "kh": kh, "kw": kw, "cout": cout}
    if use_bias:
        out["bias"] = jnp.pad(p["b"], (0, Np - cout)).reshape(1, Np).astype(
            jnp.float32)
    return out


def prepare_params(P):
    # CBL convs: bias is dropped (constant per-channel shift cancels exactly
    # under training-mode BatchNorm).  Raw convs / heads keep their bias.
    cbl = lambda p: _prep_conv(p, use_bias=False)
    raw = lambda p: _prep_conv(p, use_bias=True)
    res = lambda p: {"c1": cbl(p["c1"]), "c2": cbl(p["c2"])}

    Q = {}
    Q["first1"] = cbl(P["first1"])
    Q["first2"] = cbl(P["first2"])
    Q["rb1"] = [res(p) for p in P["rb1"]]
    Q["conv1"] = raw(P["conv1"])
    Q["rb2"] = [res(p) for p in P["rb2"]]
    Q["conv2"] = raw(P["conv2"])
    Q["rb3"] = [res(p) for p in P["rb3"]]
    Q["conv3"] = raw(P["conv3"])
    Q["rb4"] = [res(p) for p in P["rb4"]]
    Q["conv4"] = raw(P["conv4"])
    Q["rb5"] = [res(p) for p in P["rb5"]]
    Q["convblock"] = [cbl(p) for p in P["convblock"]]
    Q["scale3_out"] = raw(P["scale3_out"])
    Q["scale2_tmp"] = raw(P["scale2_tmp"])
    Q["scale2_cb"] = [cbl(p) for p in P["scale2_cb"]]
    Q["scale2_out"] = raw(P["scale2_out"])
    Q["scale1_tmp"] = raw(P["scale1_tmp"])
    Q["scale1_cb"] = [cbl(p) for p in P["scale1_cb"]]
    Q["scale1_out"] = raw(P["scale1_out"])
    return Q


# ----------------------------------------------------------------------------
# Forward pass
# ----------------------------------------------------------------------------
def _resblock_apply(x, p):
    out = _cbl_apply(x, p["c1"], stride=1, padding=0)
    out = _cbl_apply(out, p["c2"], stride=1, padding=1, residual=x)
    return out


def _convblock_apply(x, layers):
    for p in layers:
        x = _cbl_apply(x, p, stride=1, padding=1 if p["kh"] == 3 else 0)
    return x


def _upsample2x(x):  # nearest-neighbor, scale_factor=2 (NHWC)
    return jnp.repeat(jnp.repeat(x, 2, axis=1), 2, axis=2)


def yolov3_forward(params, x_nchw):
    # Inputs / outputs are NCHW to match PyTorch; compute is NHWC.
    x = jnp.transpose(x_nchw, (0, 2, 3, 1)).astype(jnp.float32)

    x = _cbl_apply(x, params["first1"], stride=1, padding=1)
    x = _cbl_apply(x, params["first2"], stride=2, padding=1)
    for p in params["rb1"]:
        x = _resblock_apply(x, p)
    # conv1..conv4 are raw convs (no BN / activation), as in the reference.
    x = _conv_apply(x, params["conv1"], stride=2, padding=1)
    for p in params["rb2"]:
        x = _resblock_apply(x, p)
    x = _conv_apply(x, params["conv2"], stride=2, padding=1)
    for p in params["rb3"]:
        x = _resblock_apply(x, p)
    scale1 = x
    x = _conv_apply(x, params["conv3"], stride=2, padding=1)
    for p in params["rb4"]:
        x = _resblock_apply(x, p)
    scale2 = x
    x = _conv_apply(x, params["conv4"], stride=2, padding=1)
    for p in params["rb5"]:
        x = _resblock_apply(x, p)
    x = _convblock_apply(x, params["convblock"])

    scale3_out = _conv_apply(x, params["scale3_out"], 1, 0)

    s2t = _conv_apply(x, params["scale2_tmp"], 1, 0)
    s2u = _upsample2x(s2t)
    x = jnp.concatenate([scale2, s2u], axis=-1)
    x = _convblock_apply(x, params["scale2_cb"])
    scale2_out = _conv_apply(x, params["scale2_out"], 1, 0)

    s1t = _conv_apply(x, params["scale1_tmp"], 1, 0)
    s1u = _upsample2x(s1t)
    x = jnp.concatenate([scale1, s1u], axis=-1)
    x = _convblock_apply(x, params["scale1_cb"])
    scale1_out = _conv_apply(x, params["scale1_out"], 1, 0)

    to_nchw = lambda t: jnp.transpose(t, (0, 3, 1, 2))
    return to_nchw(scale3_out), to_nchw(scale2_out), to_nchw(scale1_out)


# ----------------------------------------------------------------------------
if __name__ == "__main__":
    raw_params = make_yolov3_params(seed=0, in_channel=3, class_n=80)
    params = prepare_params(raw_params)   # weights pre-transposed/padded/bf16

    key = jax.random.PRNGKey(0)
    # Small input consistent with the architecture (32x downsampling):
    # NCHW = (1, 3, 64, 64) -> heads at 2x2, 4x4, 8x8 with 255 channels each.
    x = jax.random.normal(key, (1, 3, 64, 64), dtype=jnp.float32)

    s3, s2, s1 = yolov3_forward(params, x)
    jax.block_until_ready((s3, s2, s1))

    assert s3.shape == (1, 255, 2, 2), s3.shape
    assert s2.shape == (1, 255, 4, 4), s2.shape
    assert s1.shape == (1, 255, 8, 8), s1.shape
    assert all(bool(jnp.all(jnp.isfinite(t))) for t in (s3, s2, s1))
    print("KERNEL_OK")
</pallas_src>

<mosaic_0001>
module attributes {stable_mosaic.version = 11 : i64} {
  func.func @_matmul_stats_kernel(%arg0: i32, %arg1: i32, %arg2: i32, %arg3: memref<512x128xbf16, #tpu.memory_space<vmem>>, %arg4: memref<128x128xbf16, #tpu.memory_space<vmem>>, %arg5: memref<512x128xf32, #tpu.memory_space<vmem>>, %arg6: memref<8x128xf32, #tpu.memory_space<vmem>>, %arg7: memref<8x128xf32, #tpu.memory_space<vmem>>, %arg8: memref<512x128xf32, #tpu.memory_space<vmem>>) attributes {dimension_semantics = [#tpu.dimension_semantics<parallel>, #tpu.dimension_semantics<parallel>, #tpu.dimension_semantics<arbitrary>], iteration_bounds = array<i64: 8, 1, 1>, scalar_prefetch = 0 : i64, scratch_operands = 1 : i64, tpu.core_type = #tpu.core_type<tc>, window_params = [{transform_indices = @transform_0, window_bounds = array<i64: 512, 128>}, {transform_indices = @transform_1, window_bounds = array<i64: 128, 128>}, {transform_indices = @transform_2, window_bounds = array<i64: 512, 128>}, {transform_indices = @transform_3, window_bounds = array<i64: 8, 128>}, {transform_indices = @transform_4, window_bounds = array<i64: 8, 128>}]} {
    %c0_i32 = arith.constant 0 : i32
    %0 = arith.cmpi eq, %arg2, %c0_i32 : i32
    %1 = arith.extui %0 : i1 to i32
    %c0_i32_0 = arith.constant 0 : i32
    %2 = arith.cmpi ne, %1, %c0_i32_0 : i32
    scf.if %2 {
      %cst_10 = arith.constant 0.000000e+00 : f32
      %12 = vector.broadcast %cst_10 : f32 to vector<512x128xf32>
      %c0_11 = arith.constant 0 : index
      %c0_12 = arith.constant 0 : index
      %13 = vector.load %arg8[%c0_11, %c0_12] : memref<512x128xf32, #tpu.memory_space<vmem>>, vector<512x128xf32>
      tpu.vector_store %arg8[%c0_11, %c0_12], %12 {strides = array<i32>} : memref<512x128xf32, #tpu.memory_space<vmem>>, vector<512x128xf32>,
    } else {
    }
    %c0 = arith.constant 0 : index
    %c0_1 = arith.constant 0 : index
    %3 = vector.load %arg8[%c0, %c0_1] : memref<512x128xf32, #tpu.memory_space<vmem>>, vector<512x128xf32>
    %c0_2 = arith.constant 0 : index
    %c0_3 = arith.constant 0 : index
    %4 = vector.load %arg3[%c0_2, %c0_3] : memref<512x128xbf16, #tpu.memory_space<vmem>>, vector<512x128xbf16>
    %c0_4 = arith.constant 0 : index
    %c0_5 = arith.constant 0 : index
    %5 = vector.load %arg4[%c0_4, %c0_5] : memref<128x128xbf16, #tpu.memory_space<vmem>>, vector<128x128xbf16>
    %cst = arith.constant dense<0.000000e+00> : vector<512x128xf32>
    %6 = tpu.matmul %4, %5, %cst {dimension_numbers = #tpu.dot_dimension_numbers<[1], [0], [0], [1], [0, 0, 1, 1], [], []>} : vector<512x128xbf16>, vector<128x128xbf16>, vector<512x128xf32> -> vector<512x128xf32>
    %7 = arith.addf %3, %6 : vector<512x128xf32>
    %c0_6 = arith.constant 0 : index
    %c0_7 = arith.constant 0 : index
    %8 = vector.load %arg8[%c0_6, %c0_7] : memref<512x128xf32, #tpu.memory_space<vmem>>, vector<512x128xf32>
    tpu.vector_store %arg8[%c0_6, %c0_7], %7 {strides = array<i32>} : memref<512x128xf32, #tpu.memory_space<vmem>>, vector<512x128xf32>,
    %c0_i32_8 = arith.constant 0 : i32
    %9 = arith.cmpi eq, %arg2, %c0_i32_8 : i32
    %10 = arith.extui %9 : i1 to i32
    %c0_i32_9 = arith.constant 0 : i32
    %11 = arith.cmpi ne, %10, %c0_i32_9 : i32
    scf.if %11 {
      %c0_10 = arith.constant 0 : index
      %c0_11 = arith.constant 0 : index
      %12 = vector.load %arg8[%c0_10, %c0_11] : memref<512x128xf32, #tpu.memory_space<vmem>>, vector<512x128xf32>
      %c0_12 = arith.constant 0 : index
      %c0_13 = arith.constant 0 : index
      %13 = vector.load %arg5[%c0_12, %c0_13] : memref<512x128xf32, #tpu.memory_space<vmem>>, vector<512x128xf32>
      tpu.vector_store %arg5[%c0_12, %c0_13], %12 {strides = array<i32>} : memref<512x128xf32, #tpu.memory_space<vmem>>, vector<512x128xf32>,
      %cst_14 = arith.constant dense<0.000000e+00> : vector<128xf32>
      %14 = vector.multi_reduction <add>, %12, %cst_14 [0] : vector<512x128xf32> to vector<128xf32>
      %15 = vector.shape_cast %14 : vector<128xf32> to vector<1x128xf32>
      %16 = arith.mulf %12, %12 : vector<512x128xf32>
      %cst_15 = arith.constant dense<0.000000e+00> : vector<128xf32>
      %17 = vector.multi_reduction <add>, %16, %cst_15 [0] : vector<512x128xf32> to vector<128xf32>
      %18 = vector.shape_cast %17 : vector<128xf32> to vector<1x128xf32>
      %19 = tpu.iota {dimensions = array<i32: 0>} : vector<8x128xi32>
      %c0_i32_16 = arith.constant 0 : i32
      %20 = vector.broadcast %c0_i32_16 : i32 to vector<8x128xi32>
      %21 = arith.cmpi eq, %19, %20 : vector<8x128xi32>
      %cst_17 = arith.constant 0.000000e+00 : f32
      %22 = vector.shape_cast %15 : vector<1x128xf32> to vector<1x128xf32>
      %23 = vector.broadcast %22 : vector<1x128xf32> to vector<8x128xf32>
      %24 = vector.broadcast %cst_17 : f32 to vector<8x128xf32>
      %25 = arith.select %21, %23, %24 : vector<8x128xi1>, vector<8x128xf32>
      %c0_18 = arith.constant 0 : index
      %c0_19 = arith.constant 0 : index
      %26 = vector.load %arg6[%c0_18, %c0_19] : memref<8x128xf32, #tpu.memory_space<vmem>>, vector<8x128xf32>
      tpu.vector_store %arg6[%c0_18, %c0_19], %25 {strides = array<i32>} : memref<8x128xf32, #tpu.memory_space<vmem>>, vector<8x128xf32>,
      %c0_i32_20 = arith.constant 0 : i32
      %27 = vector.broadcast %c0_i32_20 : i32 to vector<8x128xi32>
      %28 = arith.cmpi eq, %19, %27 : vector<8x128xi32>
      %cst_21 = arith.constant 0.000000e+00 : f32
      %29 = vector.shape_cast %18 : vector<1x128xf32> to vector<1x128xf32>
      %30 = vector.broadcast %29 : vector<1x128xf32> to vector<8x128xf32>
      %31 = vector.broadcast %cst_21 : f32 to vector<8x128xf32>
      %32 = arith.select %28, %30, %31 : vector<8x128xi1>, vector<8x128xf32>
      %c0_22 = arith.constant 0 : index
      %c0_23 = arith.constant 0 : index
      %33 = vector.load %arg7[%c0_22, %c0_23] : memref<8x128xf32, #tpu.memory_space<vmem>>, vector<8x128xf32>
      tpu.vector_store %arg7[%c0_22, %c0_23], %32 {strides = array<i32>} : memref<8x128xf32, #tpu.memory_space<vmem>>, vector<8x128xf32>,
    } else {
    }
    return
  }
  func.func @transform_0(%arg0: i32, %arg1: i32, %arg2: i32) -> (i32, i32) {
    %c0_i32 = arith.constant 0 : i32
    return %arg0, %arg2 : i32, i32
  }
  func.func @transform_1(%arg0: i32, %arg1: i32, %arg2: i32) -> (i32, i32) {
    %c0_i32 = arith.constant 0 : i32
    return %arg2, %arg1 : i32, i32
  }
  func.func @transform_2(%arg0: i32, %arg1: i32, %arg2: i32) -> (i32, i32) {
    %c0_i32 = arith.constant 0 : i32
    return %arg0, %arg1 : i32, i32
  }
  func.func @transform_3(%arg0: i32, %arg1: i32, %arg2: i32) -> (i32, i32) {
    %c0_i32 = arith.constant 0 : i32
    return %arg0, %arg1 : i32, i32
  }
  func.func @transform_4(%arg0: i32, %arg1: i32, %arg2: i32) -> (i32, i32) {
    %c0_i32 = arith.constant 0 : i32
    return %arg0, %arg1 : i32, i32
  }
}

</mosaic_0001>

<bundles_post_ra>
// kernel: tpu_custom_call.1
= control target key start
LH: loop header
LB: loop body
LE: loop exit
PB: predicated region body
PF: predicated region fallthrough
CT: control target
= control target key end

     0   :  { %10 = vsyncpa [#allocation4], 0  ;;  %s2871_s0 = inlined_call_operand.hbm [shape: bf16[4096,128], index: 0, kind: input, shape index: {}]   ;;  %s2872_s1 = inlined_call_operand.hbm [shape: bf16[128,128], index: 1, kind: input, shape index: {}]   ;;  %s2873_s2 = inlined_call_operand.hbm [shape: f32[4096,128], index: 2, kind: output, shape index: {0}]   ;;  %s2874_s3 = inlined_call_operand.hbm [shape: f32[64,128], index: 3, kind: output, shape index: {1}]   ;;  %s2875_s4 = inlined_call_operand.hbm [shape: f32[64,128], index: 4, kind: output, shape index: {2}]  }
   0x1   :  { %12 = vsyncpa [#allocation4 + $0x1], 0 }
   0x2   :  { %13 = vsyncpa [#allocation7], 0 }
   0x3   :  { %14 = vsyncpa [#allocation5], 0 }
   0x4   :  { %16 = vsyncpa [#allocation5 + $0x1], 0 }
   0x5   :  { %17 = vsyncpa [#allocation10], 0 }
   0x6   :  { %19 = vsyncpa [#allocation10 + $0x1], 0  ;;  %s2287_s15 = smov 0   ;;  %s2289_s16 = smov 0  }
   0x7   :  { %s2291_s17 = smov 0   ;;  %s2293_s18 = smov 0  }
   0x8   :  { %s2295_s19 = smov 0   ;;  %s2297_s20 = smov 0  }
   0x9 LB: > { %s2318_s21 = sadd.s32 4294967295, %s2251_s20   ;;  %s2879_s22 = sadd.s32 4294967294, %s2251_s20   ;;  %s2251_s20 = sphi %s2297_s20, %s25_s20   ;;  %s2247_s19 = sphi %s2295_s19, %s2898_s19   ;;  %s2243_s18 = sphi %s2293_s18, %s2897_s18   ;;  %s2239_s17 = sphi %s2291_s17, %s2896_s17   ;;  %s2235_s16 = sphi %s2289_s16, %s2895_s16   ;;  %s2231_s15 = sphi %s2287_s15, %s2894_s15  }
   0xa   : > { %p66_p0 = scmp.ne.s32.totalorder %s2235_s16, %s2231_s15  ;;  %p2876_p1 = scmp.eq.s32.totalorder %s2318_s21, 0 }
   0xb   : > { %p126_p3 = scmp.eq.s32.totalorder %s2879_s22, 7  ;;  %p1721_p5 = scmp.ge.s32.totalorder %s2251_s20, 1 }
   0xc   : > { %p2329_p4 = por %p2876_p1, %p66_p0  ;;  %p189_p7 = scmp.lt.s32.totalorder %s2251_s20, 9 }
   0xd   : > { %p2334_p6 = por %p126_p3, %p66_p0  ;;  %s2253_s26 = smov [#allocation6]  }
   0xe   : > { %s2880_s23 = scalar_select %p2329_p4, 1, 0 }
   0xf   : > { %s2881_s24 = scalar_select %p2334_p6, 1, 0 }
  0x10   : > { %p2339_p8 = pnand %p1721_p5, %p189_p7  ;;  %s205_s27 = sshll.u32 %s2253_s26, 4  ;;  %s206_s27 = int_to_ptr.vmem [resolvable:$true] %s205_s27 }
  0x11   : > { %s44_s29 = sadd.s32 1, %s2247_s19  ;;  %s2047_s6 = scalar_lea.hbm %s2872_s1, 1024 }
  0x12   : > { %s2882_s25 = scalar_select %p2339_p8, 1, 0 }
  0x13   : > { %p1932_p9 = pneg %p2339_p8  ;;  %p2048_p11 = scmp.ne.s32.totalorder %s2872_s1, %s2047_s6 }
  0x14   : > { %p2054_p3 = scmp.lt.u32.totalorder %s2047_s6, %s2872_s1 }
  0x15   : > { %p2347_p10 = pnand %p1932_p9, %p2876_p1 }
  0x17   : > { %p2049_p12 = pneg %p2347_p10 }
  0x19   : > { %p2050_p13 = pnand %p2049_p12, %p2048_p11 }
  0x1b   : > { %p2051_p0 = pneg %p2050_p13 }
  0x1d   : > { %p2056_p5 = pnand %p2054_p3, %p2051_p0 }
  0x1f   : > { %2059 = shalt.err (!%p2056_p5)
}
  0x20   : > { %s2060_s11 = scalar_lea.vmem %s206_s27, 1024  ;;  %p2068_p2 = scmp.lt.s32.totalorder %s206_s27, %s206_s27 }
  0x21   : > { %p2061_p7 = scmp.ne.s32.totalorder %s206_s27, %s2060_s11  ;;  %p2069_p6 = scmp.lt.s32.totalorder %s2060_s11, %s2060_s11 }
  0x23   : > { %p2063_p9 = pnand %p2061_p7, %p2049_p12  ;;  %p2070_p4 = por %p2069_p6, %p2068_p2 }
  0x25   : > { %p2064_p1 = pneg %p2063_p9 }
  0x27   : > { %p2071_p8 = pnand %p2070_p4, %p2064_p1 }
  0x29   : > { %2074 = shalt.err (!%p2071_p8)
}
  0x2a   : > { %s2254_s12 = smov 64   ;;  %s2255_s13 = smov 4  }
  0x2b   : > { %1935 = dma.hbm_to_vmem [thread:$0]  (!%p2347_p10), %s2872_s1, 1024, %s206_s27, [#allocation7], %s2254_s12, %s2254_s12, %s2255_s13  }
  0x2c   : > { %p46_p1 = scmp.ge.s32.totalorder %s44_s29, 8  ;;  %s53_s30 = sadd.s32 1, %s2239_s17 }
  0x2d   : > { %p60_p2 = scmp.ne.s32.totalorder %s2239_s17, %s2235_s16  ;;  %p61_p4 = scmp.eq.s32.totalorder %s2251_s20, 0 }
  0x2e   : > { %s2900_s29 = smov (%p46_p1, %s44_s29), 0  ;;  %p2885_p8 = scmp.eq.s32.totalorder %s2318_s21, 7 }
  0x2f   : > { %p2377_p6 = por %p61_p4, %p60_p2  ;;  %s48_s6 = ssub.s32 %s2247_s19, %s2900_s29 }
  0x30   : > { %p2383_p11 = por %p2885_p8, %p60_p2  ;;  %p1951_p12 = scmp.lt.s32.totalorder %s2251_s20, 8 }
  0x31   : > { %p51_p10 = scmp.eq.s32.totalorder %s48_s6, 0  ;;  %s219_s27 = sand.u32 1, %s2239_s17  }
  0x32   : > { %s1724_s7 = sshll.u32 %s219_s27, 8  ;;  %s1782_s9 = sshll.u32 %s2247_s19, 12 }
  0x33   : > { %s2392_s8 = scalar_select %p51_p10, %s2239_s17, %s53_s30  }
  0x34   : > { %s2398_s14 = scalar_lea.hbm %s2871_s0, %s1782_s9  ;;  %s223_s26 = scalar_lea.vmem [#allocation3], %s1724_s7 }
  0x35   : > { %s231_s22 = sshll.u32 %s223_s26, 4  ;;  %p2404_p13 = pnand %p1951_p12, %p2377_p6  ;;  %s2400_s22 = int_to_ptr.vmem [resolvable:$true] %s231_s22 }
  0x36   : > { %s2408_s30 = scalar_lea.sflag [#allocation4], %s219_s27  ;;  %s2075_s10 = scalar_lea.hbm %s2398_s14, 4096 }
  0x37   : > { %p2076_p0 = scmp.ne.s32.totalorder %s2398_s14, %s2075_s10  ;;  %p2077_p3 = pneg %p2404_p13 }
  0x38   : > { %s2080_s5 = scalar_lea.hbm %s2871_s0, 32768  ;;  %p2081_p9 = scmp.lt.u32.totalorder %s2398_s14, %s2871_s0 }
  0x39   : > { %p2078_p5 = pnand %p2077_p3, %p2076_p0  ;;  %p2082_p1 = scmp.lt.u32.totalorder %s2080_s5, %s2075_s10 }
  0x3a   : > { %p2084_p4 = scmp.lt.u32.totalorder %s2075_s10, %s2398_s14 }
  0x3b   : > { %p2079_p7 = pneg %p2078_p5  ;;  %p2083_p2 = por %p2082_p1, %p2081_p9 }
  0x3d   : > { %p2085_p6 = por %p2084_p4, %p2083_p2 }
  0x3f   : > { %p2086_p8 = pnand %p2085_p6, %p2079_p7 }
  0x41   : > { %2089 = shalt.err (!%p2086_p8)
}
  0x42   : > { %s2090_s27 = scalar_lea.vmem %s2400_s22, 4096  ;;  %s2256_s7 = smov [#allocation3]  }
  0x43   : > { %p2091_p12 = scmp.ne.s32.totalorder %s2400_s22, %s2090_s27  ;;  %s2095_s9 = sshll.u32 %s2256_s7, 4  ;;  %s2096_s9 = int_to_ptr.vmem [resolvable:$false] %s2095_s9 }
  0x44   : > { %s2097_s11 = scalar_lea.vmem %s2096_s9, 8192  ;;  %p2098_p5 = scmp.lt.s32.totalorder %s2400_s22, %s2096_s9 }
  0x45   : > { %p2093_p10 = pnand %p2091_p12, %p2077_p3  ;;  %p2099_p9 = scmp.lt.s32.totalorder %s2097_s11, %s2090_s27 }
  0x47   : > { %p2094_p0 = pneg %p2093_p10  ;;  %p2100_p1 = por %p2099_p9, %p2098_p5 }
  0x49   : > { %p2101_p2 = pnand %p2100_p1, %p2094_p0 }
  0x4b   : > { %2104 = shalt.err (!%p2101_p2)
}
  0x4c   : > { %1939 = dma.hbm_to_vmem [thread:$0]  (!%p2404_p13), %s2398_s14, 4096, %s2400_s22, %s2408_s30, %s2254_s12, %s2254_s12, %s2255_s13  }
  0x4d   : > { %p2888_p3 = scmp.ne.s32.totalorder %s2882_s25, 0 }
  0x4e   : > { %s2442_s10 = sand.u32 (!%p2888_p3), 1, %s2235_s16   ;;  %p2889_p7 = scmp.ne.s32.totalorder (!%p2888_p3), %s2880_s23, 0 }
  0x4f   : > { %243 = sbr.rel (%p2888_p3) target bundleno = 525 (0x20d), region = 28  ;;  %s1728_s5 = sshll.u32 (!%p2888_p3), %s2442_s10, 8 }
  0x50   : > { %s246_s26 = scalar_lea.sflag (!%p2888_p3), [#allocation4], %s2442_s10  ;;  %s2446_s27 = scalar_lea.vmem (!%p2888_p3), [#allocation3], %s1728_s5 }
  0x56   : > { %2214 = dma.done.wait (%p2889_p7), %s246_s26, 4096  }
  0x57   : > { %2216 = vsyncadd (%p2889_p7), %s246_s26, 4294963200  ;;  %p2890_p13 = scmp.eq.s32.totalorder %s2318_s21, 0 }
  0x59   : > { %2218 = dma.done.wait (%p2890_p13), [#allocation7], 1024   ;;  %p2891_p4 = pmov %p2890_p13 }
  0x5a   : > { %v2007_v0 = vld [vmem:[#allocation6] sm:$0xff]   ;;  %v2008_v1 = vld [vmem:[#allocation6 + $0x8] sm:$0xff]   ;;  %v2009_v2 = vld [vmem:[#allocation6 + $0x10] sm:$0xff]   ;;  %s1730_s22 = sshll.u32 %s2442_s10, 9  ;;  %s1783_s25 = sshll.u32 %s2243_s18, 13 }
  0x5b   : > { %2220 = vsyncadd (%p2891_p4), [#allocation7], 4294966272  ;;  %1824 = vmatprep.subr.bf16.mxu0 %v2007_v0  ;;  %1904 = vmatprep.subr.bf16.mxu1 %v2007_v0  ;;  %v2010_v3 = vld [vmem:[#allocation6 + $0x18] sm:$0xff]   ;;  %v2015_v4 = vld [vmem:[%s2446_s27] sm:$0xff]   ;;  %s2491_s23 = scalar_lea.vmem [#allocation8], %s1730_s22  ;;  %s2643_s6 = scalar_lea.hbm %s2873_s2, %s1783_s25 }
  0x5c   : > { %1825 = vmatpush3.bf16.msra.mxu0 %v2007_v0  ;;  %1912 = vmatpush3.bf16.msra.mxu1 %v2007_v0  ;;  %v2011_v5 = vld [vmem:[#allocation6 + $0x20] sm:$0xff]   ;;  %v2012_v6 = vld [vmem:[#allocation6 + $0x28] sm:$0xff]   ;;  %v2013_v7 = vld [vmem:[#allocation6 + $0x30] sm:$0xff]   ;;  %s1526_s12 = sshll.u32 %s2491_s23, 4  ;;  %s1502_s30 = scalar_lea.sflag [#allocation5], %s2442_s10  ;;  %s2645_s12 = int_to_ptr.vmem [resolvable:$true] %s1526_s12 }
  0x5d   : > { %1826 = vmatprep.subr.bf16.mxu0 %v2008_v1  ;;  %1905 = vmatprep.subr.bf16.mxu1 %v2008_v1  ;;  %v2014_v8 = vld [vmem:[#allocation6 + $0x38] sm:$0xff]   ;;  %v2031_v9 = vld [vmem:[%s2446_s27 + $0x80] sm:$0xff]   ;;  %v2016_v10 = vld [vmem:[%s2446_s27 + $0x8] sm:$0xff]   ;;  %s2105_s7 = scalar_lea.vmem %s2645_s12, 8192  ;;  %s2257_s9 = smov [#allocation8]  }
  0x5e   : > { %1840 = vmatprep.mubr.bf16.mxu0 %v2015_v4  ;;  %1872 = vmatprep.mubr.bf16.mxu1 %v2031_v9  ;;  %v2017_v11 = vld [vmem:[%s2446_s27 + $0x10] sm:$0xff]   ;;  %v2032_v12 = vld [vmem:[%s2446_s27 + $0x88] sm:$0xff]   ;;  %v2018_v14 = vld [vmem:[%s2446_s27 + $0x18] sm:$0xff]   ;;  %p2106_p6 = scmp.ne.s32.totalorder %s2645_s12, %s2105_s7  ;;  %s2109_s11 = sshll.u32 %s2257_s9, 4  ;;  %s2110_s11 = int_to_ptr.vmem [resolvable:$false] %s2109_s11 }
  0x5f   : > { %v2033_v13 = vld [vmem:[%s2446_s27 + $0x90] sm:$0xff]   ;;  %v2019_v15 = vld [vmem:[%s2446_s27 + $0x20] sm:$0xff]   ;;  %v2034_v16 = vld [vmem:[%s2446_s27 + $0x98] sm:$0xff]   ;;  %s2111_s5 = scalar_lea.vmem %s2110_s11, 16384  ;;  %p2112_p10 = scmp.lt.s32.totalorder %s2645_s12, %s2110_s11 }
  0x60   : > { %1827 = vmatpush3.bf16.msra.mxu0 %v2008_v1  ;;  %1913 = vmatpush3.bf16.msra.mxu1 %v2008_v1  ;;  %v2035_v17 = vld [vmem:[%s2446_s27 + $0xa0] sm:$0xff]   ;;  %v2020_v18 = vld [vmem:[%s2446_s27 + $0x28] sm:$0xff]   ;;  %v2021_v20 = vld [vmem:[%s2446_s27 + $0x30] sm:$0xff]   ;;  %p2107_p8 = pnand %p2106_p6, %p2383_p11  ;;  %p2113_p0 = scmp.lt.s32.totalorder %s2111_s5, %s2105_s7 }
  0x61   : > { %1828 = vmatprep.subr.bf16.mxu0 %v2009_v2  ;;  %1906 = vmatprep.subr.bf16.mxu1 %v2009_v2  ;;  %v2036_v19 = vld [vmem:[%s2446_s27 + $0xa8] sm:$0xff]   ;;  %v2037_v21 = vld [vmem:[%s2446_s27 + $0xb0] sm:$0xff]   ;;  %v2022_v22 = vld [vmem:[%s2446_s27 + $0x38] sm:$0xff]  }
  0x62   : > { %v2038_v23 = vld [vmem:[%s2446_s27 + $0xb8] sm:$0xff]   ;;  %v2023_v24 = vld [vmem:[%s2446_s27 + $0x40] sm:$0xff]   ;;  %v2024_v26 = vld [vmem:[%s2446_s27 + $0x48] sm:$0xff]   ;;  %p2108_p12 = pneg %p2107_p8  ;;  %p2114_p5 = por %p2113_p0, %p2112_p10 }
  0x63   : > { %v2039_v25 = vld [vmem:[%s2446_s27 + $0xc0] sm:$0xff]   ;;  %v2040_v27 = vld [vmem:[%s2446_s27 + $0xc8] sm:$0xff]   ;;  %v2025_v28 = vld [vmem:[%s2446_s27 + $0x50] sm:$0xff]  }
  0x64   : > { %1829 = vmatpush3.bf16.msra.mxu0 %v2009_v2  ;;  %1914 = vmatpush3.bf16.msra.mxu1 %v2009_v2  ;;  %v2041_v29 = vld [vmem:[%s2446_s27 + $0xd0] sm:$0xff]   ;;  %v2026_v30 = vld [vmem:[%s2446_s27 + $0x58] sm:$0xff]   ;;  %v2027_v32 = vld [vmem:[%s2446_s27 + $0x60] sm:$0xff]   ;;  %p2115_p9 = pnand %p2114_p5, %p2108_p12 }
  0x65   : > { %1830 = vmatprep.subr.bf16.mxu0 %v2010_v3  ;;  %1907 = vmatprep.subr.bf16.mxu1 %v2010_v3  ;;  %v2042_v31 = vld [vmem:[%s2446_s27 + $0xd8] sm:$0xff]   ;;  %v2043_v33 = vld [vmem:[%s2446_s27 + $0xe0] sm:$0xff]   ;;  %v2028_v34 = vld [vmem:[%s2446_s27 + $0x68] sm:$0xff]  }
  0x66   : > { %v2044_v35 = vld [vmem:[%s2446_s27 + $0xe8] sm:$0xff]   ;;  %v2029_v36 = vld [vmem:[%s2446_s27 + $0x70] sm:$0xff]   ;;  %v2030_v38 = vld [vmem:[%s2446_s27 + $0x78] sm:$0xff]  }
  0x67   : > { %v2045_v37 = vld [vmem:[%s2446_s27 + $0xf0] sm:$0xff]   ;;  %v2046_v39 = vld [vmem:[%s2446_s27 + $0xf8] sm:$0xff]  }
  0x68   : > { %1831 = vmatpush3.bf16.msra.mxu0 %v2010_v3  ;;  %1915 = vmatpush3.bf16.msra.mxu1 %v2010_v3 }
  0x69   : > { %1832 = vmatprep.subr.bf16.mxu0 %v2011_v5  ;;  %1908 = vmatprep.subr.bf16.mxu1 %v2011_v5 }
  0x6c   : > { %1833 = vmatpush3.bf16.msra.mxu0 %v2011_v5  ;;  %1916 = vmatpush3.bf16.msra.mxu1 %v2011_v5 }
  0x6d   : > { %1834 = vmatprep.subr.bf16.mxu0 %v2012_v6  ;;  %1909 = vmatprep.subr.bf16.mxu1 %v2012_v6 }
  0x70   : > { %1835 = vmatpush3.bf16.msra.mxu0 %v2012_v6  ;;  %1917 = vmatpush3.bf16.msra.mxu1 %v2012_v6 }
  0x71   : > { %1836 = vmatprep.subr.bf16.mxu0 %v2013_v7  ;;  %1910 = vmatprep.subr.bf16.mxu1 %v2013_v7 }
  0x74   : > { %1837 = vmatpush3.bf16.msra.mxu0 %v2013_v7  ;;  %1918 = vmatpush3.bf16.msra.mxu1 %v2013_v7 }
  0x75   : > { %1838 = vmatprep.subr.bf16.mxu0 %v2014_v8  ;;  %1911 = vmatprep.subr.bf16.mxu1 %v2014_v8 }
  0x78   : > { %1839 = vmatpush3.bf16.msra.mxu0 %v2014_v8  ;;  %1919 = vmatpush3.bf16.msra.mxu1 %v2014_v8 }
  0x7b   : > { %1841 = vmatmul.mubr.bf16.vlgmr.msra.gmra.mrb[0].mxu0 %v2016_v10  ;;  %1873 = vmatmul.mubr.bf16.vlgmr.msra.gmra.mrb[0].mxu1 %v2032_v12 }
  0x7c   : > { %1844 = vmatprep.mubr.bf16.mxu0 %v2017_v11  ;;  %1876 = vmatprep.mubr.bf16.mxu1 %v2033_v13 }
  0x83   : > { %1845 = vmatmul.mubr.bf16.gmra.mrb[4].mxu0 %v2018_v14  ;;  %1877 = vmatmul.mubr.bf16.gmra.mrb[4].mxu1 %v2034_v16 }
  0x84   : > { %1848 = vmatprep.mubr.bf16.mxu0 %v2019_v15  ;;  %1880 = vmatprep.mubr.bf16.mxu1 %v2035_v17 }
  0x8b   : > { %1849 = vmatmul.mubr.bf16.gmra.mrb[8].mxu0 %v2020_v18  ;;  %1881 = vmatmul.mubr.bf16.gmra.mrb[8].mxu1 %v2036_v19 }
  0x8c   : > { %1852 = vmatprep.mubr.bf16.mxu0 %v2021_v20  ;;  %1884 = vmatprep.mubr.bf16.mxu1 %v2037_v21 }
  0x93   : > { %1853 = vmatmul.mubr.bf16.gmra.mrb[12].mxu0 %v2022_v22  ;;  %1885 = vmatmul.mubr.bf16.gmra.mrb[12].mxu1 %v2038_v23 }
  0x94   : > { %1856 = vmatprep.mubr.bf16.mxu0 %v2023_v24  ;;  %1888 = vmatprep.mubr.bf16.mxu1 %v2039_v25 }
  0x9b   : > { %1857 = vmatmul.mubr.bf16.gmra.mrb[16].mxu0 %v2024_v26  ;;  %1889 = vmatmul.mubr.bf16.gmra.mrb[16].mxu1 %v2040_v27 }
  0x9c   : > { %1860 = vmatprep.mubr.bf16.mxu0 %v2025_v28  ;;  %1892 = vmatprep.mubr.bf16.mxu1 %v2041_v29 }
  0xa3   : > { %1861 = vmatmul.mubr.bf16.gmra.mrb[20].mxu0 %v2026_v30  ;;  %1893 = vmatmul.mubr.bf16.gmra.mrb[20].mxu1 %v2042_v31 }
  0xa4   : > { %1864 = vmatprep.mubr.bf16.mxu0 %v2027_v32  ;;  %1896 = vmatprep.mubr.bf16.mxu1 %v2043_v33 }
  0xab   : > { %1865 = vmatmul.mubr.bf16.gmra.mrb[24].mxu0 %v2028_v34  ;;  %1897 = vmatmul.mubr.bf16.gmra.mrb[24].mxu1 %v2044_v35 }
  0xac   : > { %1868 = vmatprep.mubr.bf16.mxu0 %v2029_v36  ;;  %1900 = vmatprep.mubr.bf16.mxu1 %v2045_v37 }
  0xb3   : > { %1869 = vmatmul.mubr.bf16.gmra.mrb[28].mxu0 %v2030_v38  ;;  %1901 = vmatmul.mubr.bf16.gmra.mrb[28].mxu1 %v2046_v39 }
 0x14e   : > { %v1842_v40 = vpop.f32.mrb[0].mxu0  ;;  %v2489_v41 = vpop.f32.mrb[0].mxu1 }
 0x14f   : > { %1230 = vst [vmem:[%s2491_s23 + $0x10] sm:$0xff] %v1842_v40  ;;  %v778_v42 = vpop.f32.mrb[1].mxu0  ;;  %1262 = vst [vmem:[%s2491_s23 + $0x110] sm:$0xff] %v2489_v41  ;;  %v2496_v43 = vpop.f32.mrb[1].mxu1  ;;  %v1363_v51 = vmul.f32 %v1842_v40, %v1842_v40 }
 0x150   : > { %1228 = vst [vmem:[%s2491_s23] sm:$0xff] %v778_v42  ;;  %v1843_v44 = vpop.f32.mrb[2].mxu0  ;;  %1260 = vst [vmem:[%s2491_s23 + $0x100] sm:$0xff] %v2496_v43  ;;  %v2501_v45 = vpop.f32.mrb[2].mxu1  ;;  %v1361_v48 = vmul.f32 %v778_v42, %v778_v42 }
 0x151   : > { %1231 = vst [vmem:[%s2491_s23 + $0x18] sm:$0xff] %v1843_v44  ;;  %v781_v46 = vpop.f32.mrb[3].mxu0  ;;  %1263 = vst [vmem:[%s2491_s23 + $0x118] sm:$0xff] %v2501_v45  ;;  %v2506_v47 = vpop.f32.mrb[3].mxu1  ;;  %v1364_v54 = vmul.f32 %v1843_v44, %v1843_v44 }
 0x152   : > { %1229 = vst [vmem:[%s2491_s23 + $0x8] sm:$0xff] %v781_v46  ;;  %v1292_v49 = vadd.f32 %v781_v46, %v778_v42  ;;  %v1362_v50 = vmul.f32 %v781_v46, %v781_v46  ;;  %1261 = vst [vmem:[%s2491_s23 + $0x108] sm:$0xff] %v2506_v47 }
 0x154   : > { %v1293_v52 = vadd.f32 %v1842_v40, %v1292_v49  ;;  %v1425_v53 = vadd.f32 %v1362_v50, %v1361_v48 }
 0x156   : > { %v1426_v55 = vadd.f32 %v1425_v53, %v1363_v51  ;;  %v1846_v56 = vpop.f32.mrb[4].mxu0  ;;  %v1294_v57 = vadd.f32 %v1843_v44, %v1293_v52  ;;  %v2511_v58 = vpop.f32.mrb[4].mxu1 }
 0x157   : > { %1234 = vst [vmem:[%s2491_s23 + $0x30] sm:$0xff] %v1846_v56  ;;  %v794_v59 = vpop.f32.mrb[5].mxu0  ;;  %1266 = vst [vmem:[%s2491_s23 + $0x130] sm:$0xff] %v2511_v58  ;;  %v2516_v60 = vpop.f32.mrb[5].mxu1  ;;  %v1367_v7 = vmul.f32 %v1846_v56, %v1846_v56 }
 0x158   : > { %1232 = vst [vmem:[%s2491_s23 + $0x20] sm:$0xff] %v794_v59  ;;  %v1295_v61 = vadd.f32 %v1294_v57, %v794_v59  ;;  %v1365_v62 = vmul.f32 %v794_v59, %v794_v59  ;;  %v1427_v63 = vadd.f32 %v1426_v55, %v1364_v54  ;;  %v1847_v0 = vpop.f32.mrb[6].mxu0  ;;  %1264 = vst [vmem:[%s2491_s23 + $0x120] sm:$0xff] %v2516_v60  ;;  %v2521_v1 = vpop.f32.mrb[6].mxu1 }
 0x159   : > { %1235 = vst [vmem:[%s2491_s23 + $0x38] sm:$0xff] %v1847_v0  ;;  %v797_v2 = vpop.f32.mrb[7].mxu0  ;;  %1267 = vst [vmem:[%s2491_s23 + $0x138] sm:$0xff] %v2521_v1  ;;  %v2526_v3 = vpop.f32.mrb[7].mxu1  ;;  %v1368_v10 = vmul.f32 %v1847_v0, %v1847_v0 }
 0x15a   : > { %v1428_v4 = vadd.f32 %v1427_v63, %v1365_v62  ;;  %1233 = vst [vmem:[%s2491_s23 + $0x28] sm:$0xff] %v797_v2  ;;  %v1296_v5 = vadd.f32 %v1295_v61, %v797_v2  ;;  %v1366_v6 = vmul.f32 %v797_v2, %v797_v2  ;;  %1265 = vst [vmem:[%s2491_s23 + $0x128] sm:$0xff] %v2526_v3 }
 0x15c   : > { %v1297_v8 = vadd.f32 %v1846_v56, %v1296_v5  ;;  %v1429_v9 = vadd.f32 %v1428_v4, %v1366_v6 }
 0x15e   : > { %v1430_v11 = vadd.f32 %v1429_v9, %v1367_v7  ;;  %v1850_v12 = vpop.f32.mrb[8].mxu0  ;;  %v1298_v13 = vadd.f32 %v1847_v0, %v1297_v8  ;;  %v2531_v14 = vpop.f32.mrb[8].mxu1 }
 0x15f   : > { %1238 = vst [vmem:[%s2491_s23 + $0x50] sm:$0xff] %v1850_v12  ;;  %v810_v15 = vpop.f32.mrb[9].mxu0  ;;  %1270 = vst [vmem:[%s2491_s23 + $0x150] sm:$0xff] %v2531_v14  ;;  %v2536_v16 = vpop.f32.mrb[9].mxu1  ;;  %v1371_v27 = vmul.f32 %v1850_v12, %v1850_v12 }
 0x160   : > { %1236 = vst [vmem:[%s2491_s23 + $0x40] sm:$0xff] %v810_v15  ;;  %v1299_v17 = vadd.f32 %v1298_v13, %v810_v15  ;;  %v1369_v18 = vmul.f32 %v810_v15, %v810_v15  ;;  %v1431_v19 = vadd.f32 %v1430_v11, %v1368_v10  ;;  %v1851_v20 = vpop.f32.mrb[10].mxu0  ;;  %1268 = vst [vmem:[%s2491_s23 + $0x140] sm:$0xff] %v2536_v16  ;;  %v2541_v21 = vpop.f32.mrb[10].mxu1 }
 0x161   : > { %1239 = vst [vmem:[%s2491_s23 + $0x58] sm:$0xff] %v1851_v20  ;;  %v813_v22 = vpop.f32.mrb[11].mxu0  ;;  %1271 = vst [vmem:[%s2491_s23 + $0x158] sm:$0xff] %v2541_v21  ;;  %v2546_v23 = vpop.f32.mrb[11].mxu1  ;;  %v1372_v30 = vmul.f32 %v1851_v20, %v1851_v20 }
 0x162   : > { %v1432_v24 = vadd.f32 %v1431_v19, %v1369_v18  ;;  %1237 = vst [vmem:[%s2491_s23 + $0x48] sm:$0xff] %v813_v22  ;;  %v1300_v25 = vadd.f32 %v1299_v17, %v813_v22  ;;  %v1370_v26 = vmul.f32 %v813_v22, %v813_v22  ;;  %1269 = vst [vmem:[%s2491_s23 + $0x148] sm:$0xff] %v2546_v23 }
 0x164   : > { %v1301_v28 = vadd.f32 %v1850_v12, %v1300_v25  ;;  %v1433_v29 = vadd.f32 %v1432_v24, %v1370_v26 }
 0x166   : > { %v1434_v31 = vadd.f32 %v1433_v29, %v1371_v27  ;;  %v1854_v32 = vpop.f32.mrb[12].mxu0  ;;  %v1302_v33 = vadd.f32 %v1851_v20, %v1301_v28  ;;  %v2551_v34 = vpop.f32.mrb[12].mxu1 }
 0x167   : > { %1242 = vst [vmem:[%s2491_s23 + $0x70] sm:$0xff] %v1854_v32  ;;  %v826_v35 = vpop.f32.mrb[13].mxu0  ;;  %1274 = vst [vmem:[%s2491_s23 + $0x170] sm:$0xff] %v2551_v34  ;;  %v2556_v36 = vpop.f32.mrb[13].mxu1  ;;  %v1375_v51 = vmul.f32 %v1854_v32, %v1854_v32 }
 0x168   : > { %1240 = vst [vmem:[%s2491_s23 + $0x60] sm:$0xff] %v826_v35  ;;  %v1303_v37 = vadd.f32 %v1302_v33, %v826_v35  ;;  %v1373_v38 = vmul.f32 %v826_v35, %v826_v35  ;;  %v1435_v39 = vadd.f32 %v1434_v31, %v1372_v30  ;;  %v1855_v40 = vpop.f32.mrb[14].mxu0  ;;  %1272 = vst [vmem:[%s2491_s23 + $0x160] sm:$0xff] %v2556_v36  ;;  %v2561_v42 = vpop.f32.mrb[14].mxu1 }
 0x169   : > { %1243 = vst [vmem:[%s2491_s23 + $0x78] sm:$0xff] %v1855_v40  ;;  %v829_v44 = vpop.f32.mrb[15].mxu0  ;;  %1275 = vst [vmem:[%s2491_s23 + $0x178] sm:$0xff] %v2561_v42  ;;  %v2566_v46 = vpop.f32.mrb[15].mxu1  ;;  %v1376_v54 = vmul.f32 %v1855_v40, %v1855_v40 }
 0x16a   : > { %v1436_v48 = vadd.f32 %v1435_v39, %v1373_v38  ;;  %1241 = vst [vmem:[%s2491_s23 + $0x68] sm:$0xff] %v829_v44  ;;  %v1304_v49 = vadd.f32 %v1303_v37, %v829_v44  ;;  %v1374_v50 = vmul.f32 %v829_v44, %v829_v44  ;;  %1273 = vst [vmem:[%s2491_s23 + $0x168] sm:$0xff] %v2566_v46 }
 0x16c   : > { %v1305_v52 = vadd.f32 %v1854_v32, %v1304_v49  ;;  %v1437_v53 = vadd.f32 %v1436_v48, %v1374_v50 }
 0x16e   : > { %v1438_v55 = vadd.f32 %v1437_v53, %v1375_v51  ;;  %v1858_v56 = vpop.f32.mrb[16].mxu0  ;;  %v1306_v57 = vadd.f32 %v1855_v40, %v1305_v52  ;;  %v2571_v59 = vpop.f32.mrb[16].mxu1 }
 0x16f   : > { %1246 = vst [vmem:[%s2491_s23 + $0x90] sm:$0xff] %v1858_v56  ;;  %v842_v61 = vpop.f32.mrb[17].mxu0  ;;  %1278 = vst [vmem:[%s2491_s23 + $0x190] sm:$0xff] %v2571_v59  ;;  %v2576_v62 = vpop.f32.mrb[17].mxu1  ;;  %v1379_v11 = vmul.f32 %v1858_v56, %v1858_v56 }
 0x170   : > { %1244 = vst [vmem:[%s2491_s23 + $0x80] sm:$0xff] %v842_v61  ;;  %v1307_v63 = vadd.f32 %v1306_v57, %v842_v61  ;;  %v1377_v0 = vmul.f32 %v842_v61, %v842_v61  ;;  %v1439_v2 = vadd.f32 %v1438_v55, %v1376_v54  ;;  %v1859_v4 = vpop.f32.mrb[18].mxu0  ;;  %1276 = vst [vmem:[%s2491_s23 + $0x180] sm:$0xff] %v2576_v62  ;;  %v2581_v5 = vpop.f32.mrb[18].mxu1 }
 0x171   : > { %1247 = vst [vmem:[%s2491_s23 + $0x98] sm:$0xff] %v1859_v4  ;;  %v845_v6 = vpop.f32.mrb[19].mxu0  ;;  %1279 = vst [vmem:[%s2491_s23 + $0x198] sm:$0xff] %v2581_v5  ;;  %v2586_v7 = vpop.f32.mrb[19].mxu1  ;;  %v1380_v15 = vmul.f32 %v1859_v4, %v1859_v4 }
 0x172   : > { %v1440_v8 = vadd.f32 %v1439_v2, %v1377_v0  ;;  %1245 = vst [vmem:[%s2491_s23 + $0x88] sm:$0xff] %v845_v6  ;;  %v1308_v9 = vadd.f32 %v1307_v63, %v845_v6  ;;  %v1378_v10 = vmul.f32 %v845_v6, %v845_v6  ;;  %1277 = vst [vmem:[%s2491_s23 + $0x188] sm:$0xff] %v2586_v7 }
 0x174   : > { %v1309_v12 = vadd.f32 %v1858_v56, %v1308_v9  ;;  %v1441_v13 = vadd.f32 %v1440_v8, %v1378_v10 }
 0x176   : > { %v1442_v17 = vadd.f32 %v1441_v13, %v1379_v11  ;;  %v1862_v18 = vpop.f32.mrb[20].mxu0  ;;  %v1310_v19 = vadd.f32 %v1859_v4, %v1309_v12  ;;  %v2591_v20 = vpop.f32.mrb[20].mxu1 }
 0x177   : > { %1250 = vst [vmem:[%s2491_s23 + $0xb0] sm:$0xff] %v1862_v18  ;;  %v858_v22 = vpop.f32.mrb[21].mxu0  ;;  %1282 = vst [vmem:[%s2491_s23 + $0x1b0] sm:$0xff] %v2591_v20  ;;  %v2596_v24 = vpop.f32.mrb[21].mxu1  ;;  %v1383_v37 = vmul.f32 %v1862_v18, %v1862_v18 }
 0x178   : > { %1248 = vst [vmem:[%s2491_s23 + $0xa0] sm:$0xff] %v858_v22  ;;  %v1311_v25 = vadd.f32 %v1310_v19, %v858_v22  ;;  %v1381_v26 = vmul.f32 %v858_v22, %v858_v22  ;;  %v1443_v27 = vadd.f32 %v1442_v17, %v1380_v15  ;;  %v1863_v28 = vpop.f32.mrb[22].mxu0  ;;  %1280 = vst [vmem:[%s2491_s23 + $0x1a0] sm:$0xff] %v2596_v24  ;;  %v2601_v29 = vpop.f32.mrb[22].mxu1 }
 0x179   : > { %1251 = vst [vmem:[%s2491_s23 + $0xb8] sm:$0xff] %v1863_v28  ;;  %v861_v30 = vpop.f32.mrb[23].mxu0  ;;  %1283 = vst [vmem:[%s2491_s23 + $0x1b8] sm:$0xff] %v2601_v29  ;;  %v2606_v31 = vpop.f32.mrb[23].mxu1  ;;  %v1384_v40 = vmul.f32 %v1863_v28, %v1863_v28 }
 0x17a   : > { %v1444_v32 = vadd.f32 %v1443_v27, %v1381_v26  ;;  %1249 = vst [vmem:[%s2491_s23 + $0xa8] sm:$0xff] %v861_v30  ;;  %v1312_v33 = vadd.f32 %v1311_v25, %v861_v30  ;;  %v1382_v35 = vmul.f32 %v861_v30, %v861_v30  ;;  %1281 = vst [vmem:[%s2491_s23 + $0x1a8] sm:$0xff] %v2606_v31 }
 0x17c   : > { %v1313_v38 = vadd.f32 %v1862_v18, %v1312_v33  ;;  %v1445_v39 = vadd.f32 %v1444_v32, %v1382_v35 }
 0x17e   : > { %v1446_v44 = vadd.f32 %v1445_v39, %v1383_v37  ;;  %v1866_v48 = vpop.f32.mrb[24].mxu0  ;;  %v1314_v49 = vadd.f32 %v1863_v28, %v1313_v38  ;;  %v2611_v50 = vpop.f32.mrb[24].mxu1 }
 0x17f   : > { %1254 = vst [vmem:[%s2491_s23 + $0xd0] sm:$0xff] %v1866_v48  ;;  %v874_v51 = vpop.f32.mrb[25].mxu0  ;;  %1286 = vst [vmem:[%s2491_s23 + $0x1d0] sm:$0xff] %v2611_v50  ;;  %v2616_v52 = vpop.f32.mrb[25].mxu1  ;;  %v1387_v6 = vmul.f32 %v1866_v48, %v1866_v48 }
 0x180   : > { %1252 = vst [vmem:[%s2491_s23 + $0xc0] sm:$0xff] %v874_v51  ;;  %v1315_v53 = vadd.f32 %v1314_v49, %v874_v51  ;;  %v1385_v54 = vmul.f32 %v874_v51, %v874_v51  ;;  %v1447_v55 = vadd.f32 %v1446_v44, %v1384_v40  ;;  %v1867_v56 = vpop.f32.mrb[26].mxu0  ;;  %1284 = vst [vmem:[%s2491_s23 + $0x1c0] sm:$0xff] %v2616_v52  ;;  %v2621_v57 = vpop.f32.mrb[26].mxu1 }
 0x181   : > { %1255 = vst [vmem:[%s2491_s23 + $0xd8] sm:$0xff] %v1867_v56  ;;  %v877_v61 = vpop.f32.mrb[27].mxu0  ;;  %1287 = vst [vmem:[%s2491_s23 + $0x1d8] sm:$0xff] %v2621_v57  ;;  %v2626_v63 = vpop.f32.mrb[27].mxu1  ;;  %v1388_v10 = vmul.f32 %v1867_v56, %v1867_v56 }
 0x182   : > { %v1448_v0 = vadd.f32 %v1447_v55, %v1385_v54  ;;  %1253 = vst [vmem:[%s2491_s23 + $0xc8] sm:$0xff] %v877_v61  ;;  %v1316_v2 = vadd.f32 %v1315_v53, %v877_v61  ;;  %v1386_v4 = vmul.f32 %v877_v61, %v877_v61  ;;  %1285 = vst [vmem:[%s2491_s23 + $0x1c8] sm:$0xff] %v2626_v63 }
 0x184   : > { %v1317_v8 = vadd.f32 %v1866_v48, %v1316_v2  ;;  %v1449_v9 = vadd.f32 %v1448_v0, %v1386_v4 }
 0x186   : > { %v1450_v11 = vadd.f32 %v1449_v9, %v1387_v6  ;;  %v1870_v12 = vpop.f32.mrb[28].mxu0  ;;  %v1318_v13 = vadd.f32 %v1867_v56, %v1317_v8  ;;  %v2633_v15 = vpop.f32.mrb[28].mxu1 }
 0x187   : > { %1258 = vst [vmem:[%s2491_s23 + $0xf0] sm:$0xff] %v1870_v12  ;;  %v890_v17 = vpop.f32.mrb[29].mxu0  ;;  %1290 = vst [vmem:[%s2491_s23 + $0x1f0] sm:$0xff] %v2633_v15  ;;  %v2638_v18 = vpop.f32.mrb[29].mxu1 }
 0x188   : > { %1256 = vst [vmem:[%s2491_s23 + $0xe0] sm:$0xff] %v890_v17  ;;  %v1319_v19 = vadd.f32 %v1318_v13, %v890_v17  ;;  %v1389_v22 = vmul.f32 %v890_v17, %v890_v17  ;;  %v1451_v25 = vadd.f32 %v1450_v11, %v1388_v10  ;;  %v1871_v26 = vpop.f32.mrb[30].mxu0  ;;  %1288 = vst [vmem:[%s2491_s23 + $0x1e0] sm:$0xff] %v2638_v18  ;;  %v2650_v27 = vpop.f32.mrb[30].mxu1 }
 0x189   : > { %1259 = vst [vmem:[%s2491_s23 + $0xf8] sm:$0xff] %v1871_v26  ;;  %v893_v28 = vpop.f32.mrb[31].mxu0  ;;  %1291 = vst [vmem:[%s2491_s23 + $0x1f8] sm:$0xff] %v2650_v27  ;;  %v2655_v30 = vpop.f32.mrb[31].mxu1 }
 0x18a   : > { %v1452_v32 = vadd.f32 %v1451_v25, %v1389_v22  ;;  %1257 = vst [vmem:[%s2491_s23 + $0xe8] sm:$0xff] %v893_v28  ;;  %v1320_v33 = vadd.f32 %v1319_v19, %v893_v28  ;;  %v1390_v35 = vmul.f32 %v893_v28, %v893_v28  ;;  %1289 = vst [vmem:[%s2491_s23 + $0x1e8] sm:$0xff] %v2655_v30 }
 0x18b   : > { %2118 = shalt.err (!%p2115_p9)
}
 0x18c   : > { %s2119_s26 = scalar_lea.hbm %s2643_s6, 8192  ;;  %s2123_s23 = scalar_lea.hbm %s2873_s2, 65536 }
 0x18d   : > { %p2120_p1 = scmp.ne.s32.totalorder %s2643_s6, %s2119_s26  ;;  %p2124_p7 = scmp.lt.u32.totalorder %s2643_s6, %s2873_s2 }
 0x18e   : > { %p2125_p13 = scmp.lt.u32.totalorder %s2123_s23, %s2119_s26  ;;  %p2127_p6 = scmp.lt.u32.totalorder %s2119_s26, %s2643_s6 }
 0x18f   : > { %p2121_p2 = pnand %p2120_p1, %p2383_p11 }
 0x190   : > { %p2126_p4 = por %p2125_p13, %p2124_p7 }
 0x191   : > { %p2122_p3 = pneg %p2121_p2 }
 0x192   : > { %p2128_p8 = por %p2127_p6, %p2126_p4 }
 0x194   : > { %p2129_p12 = pnand %p2128_p8, %p2122_p3 }
 0x196   : > { %2132 = shalt.err (!%p2129_p12)
}
 0x197   : > { %s2258_s14 = smov 128   ;;  %s2259_s7 = smov 8   ;;  %v1391_v37 = vmul.f32 %v1870_v12, %v1870_v12  ;;  %v1321_v38 = vadd.f32 %v1870_v12, %v1320_v33  ;;  %v1453_v39 = vadd.f32 %v1452_v32, %v1390_v35  ;;  %v1392_v40 = vmul.f32 %v1871_v26, %v1871_v26 }
 0x198   : > { %1926 = dma.vmem_to_hbm [thread:$0]  (%p2383_p11), %s2645_s12, 8192, %s2643_s6, %s1502_s30, %s2258_s14, %s2258_s14, %s2259_s7   ;;  %v1393_v49 = vmul.f32 %v2496_v43, %v2496_v43  ;;  %v1394_v56 = vmul.f32 %v2506_v47, %v2506_v47  ;;  %v1395_v61 = vmul.f32 %v2489_v41, %v2489_v41  ;;  %v1396_v4 = vmul.f32 %v2501_v45, %v2501_v45 }
 0x199   : > { %v1454_v44 = vadd.f32 %v1453_v39, %v1391_v37  ;;  %v1322_v48 = vadd.f32 %v1871_v26, %v1321_v38  ;;  %v1398_v12 = vmul.f32 %v2526_v3, %v2526_v3  ;;  %v1402_v32 = vmul.f32 %v2546_v23, %v2546_v23  ;;  %s1731_s12 = sshll.u32 %s2442_s10, 3  ;;  %s1506_s6 = sand.u32 1, %s2318_s21  }
 0x19a   : > { %s1778_s30 = sshll.u32 %s2243_s18, 7  ;;  %s280_s9 = scalar_lea.vmem [#allocation9], %s1731_s12 }
 0x19b   : > { %v1323_v51 = vadd.f32 %v1322_v48, %v2496_v43  ;;  %v1455_v53 = vadd.f32 %v1454_v44, %v1392_v40  ;;  %v1397_v43 = vmul.f32 %v2516_v60, %v2516_v60  ;;  %v1406_v48 = vmul.f32 %v2566_v46, %v2566_v46  ;;  %s1543_s11 = sshll.u32 %s280_s9, 4  ;;  %s2783_s5 = scalar_lea.vmem [#allocation11], %s1731_s12  ;;  %s2791_s11 = int_to_ptr.vmem [resolvable:$true] %s1543_s11 }
 0x19c   : > { %s1557_s26 = sshll.u32 %s2783_s5, 4  ;;  %s2789_s22 = scalar_lea.hbm %s2874_s3, %s1778_s30  ;;  %s2798_s26 = int_to_ptr.vmem [resolvable:$true] %s1557_s26 }
 0x19d   : > { %v1456_v54 = vadd.f32 %v1455_v53, %v1393_v49  ;;  %v1324_v55 = vadd.f32 %v1323_v51, %v2506_v47  ;;  %s2796_s23 = scalar_lea.hbm %s2875_s4, %s1778_s30  ;;  %s2800_s25 = scalar_lea.sflag [#allocation10], %s1506_s6 }
 0x19e   : > { %s2133_s13 = scalar_lea.vmem %s2791_s11, 128  ;;  %s2260_s14 = smov [#allocation9]  }
 0x19f   : > { %v1325_v0 = vadd.f32 %v2489_v41, %v1324_v55  ;;  %v1457_v2 = vadd.f32 %v1456_v54, %v1394_v56  ;;  %v1399_v41 = vmul.f32 %v2511_v58, %v2511_v58  ;;  %p2134_p10 = scmp.ne.s32.totalorder %s2791_s11, %s2133_s13  ;;  %s2137_s7 = sshll.u32 %s2260_s14, 4  ;;  %s2138_s7 = int_to_ptr.vmem [resolvable:$false] %s2137_s7 }
 0x1a0   : > { %s2139_s12 = scalar_lea.vmem %s2138_s7, 256  ;;  %p2140_p9 = scmp.lt.s32.totalorder %s2791_s11, %s2138_s7 }
 0x1a1   : > { %v1458_v6 = vadd.f32 %v1457_v2, %v1395_v61  ;;  %v1326_v8 = vadd.f32 %v2501_v45, %v1325_v0  ;;  %v1400_v45 = vmul.f32 %v2521_v1, %v2521_v1  ;;  %v1410_v0 = vmul.f32 %v2586_v7, %v2586_v7  ;;  %p2135_p0 = pnand %p2134_p10, %p2383_p11  ;;  %p2141_p1 = scmp.lt.s32.totalorder %s2139_s12, %s2133_s13 }
 0x1a3   : > { %v1327_v9 = vadd.f32 %v1326_v8, %v2516_v60  ;;  %v1459_v10 = vadd.f32 %v1458_v6, %v1396_v4  ;;  %v1401_v60 = vmul.f32 %v2536_v16, %v2536_v16  ;;  %p2136_p5 = pneg %p2135_p0  ;;  %p2142_p2 = por %p2141_p1, %p2140_p9 }
 0x1a5   : > { %v1460_v11 = vadd.f32 %v1459_v10, %v1397_v43  ;;  %v1328_v47 = vadd.f32 %v1327_v9, %v2526_v3  ;;  %p2143_p3 = pnand %p2142_p2, %p2136_p5 }
 0x1a7   : > { %v1329_v13 = vadd.f32 %v2511_v58, %v1328_v47  ;;  %v1461_v17 = vadd.f32 %v1460_v11, %v1398_v12  ;;  %v1403_v58 = vmul.f32 %v2531_v14, %v2531_v14  ;;  %v1414_v11 = vmul.f32 %v2606_v31, %v2606_v31 }
 0x1a9   : > { %v1462_v19 = vadd.f32 %v1461_v17, %v1399_v41  ;;  %v1330_v22 = vadd.f32 %v2521_v1, %v1329_v13  ;;  %v1404_v1 = vmul.f32 %v2541_v21, %v2541_v21 }
 0x1ab   : > { %v1331_v25 = vadd.f32 %v1330_v22, %v2536_v16  ;;  %v1463_v26 = vadd.f32 %v1462_v19, %v1400_v45  ;;  %v1405_v16 = vmul.f32 %v2556_v36, %v2556_v36  ;;  %v1418_v22 = vmul.f32 %v2626_v63, %v2626_v63 }
 0x1ad   : > { %v1464_v28 = vadd.f32 %v1463_v26, %v1401_v60  ;;  %v1332_v3 = vadd.f32 %v1331_v25, %v2546_v23 }
 0x1af   : > { %v1333_v33 = vadd.f32 %v2531_v14, %v1332_v3  ;;  %v1465_v35 = vadd.f32 %v1464_v28, %v1402_v32  ;;  %v1407_v14 = vmul.f32 %v2551_v34, %v2551_v34 }
 0x1b1   : > { %v1466_v37 = vadd.f32 %v1465_v35, %v1403_v58  ;;  %v1334_v38 = vadd.f32 %v2541_v21, %v1333_v33  ;;  %v1408_v21 = vmul.f32 %v2561_v42, %v2561_v42  ;;  %v1423_v33 = vmul.f32 %v2633_v15, %v2633_v15 }
 0x1b3   : > { %v1335_v39 = vadd.f32 %v1334_v38, %v2556_v36  ;;  %v1467_v40 = vadd.f32 %v1466_v37, %v1404_v1  ;;  %v1409_v36 = vmul.f32 %v2576_v62, %v2576_v62  ;;  %v1424_v1 = vmul.f32 %v2650_v27, %v2650_v27 }
 0x1b5   : > { %v1468_v44 = vadd.f32 %v1467_v40, %v1405_v16  ;;  %v1336_v23 = vadd.f32 %v1335_v39, %v2566_v46  ;;  %v1494_v39 = vlaneseq }
 0x1b7   : > { %v1337_v49 = vadd.f32 %v2551_v34, %v1336_v23  ;;  %v1469_v51 = vadd.f32 %v1468_v44, %v1406_v48  ;;  %v1411_v34 = vmul.f32 %v2571_v59, %v2571_v59  ;;  %v1495_v48 = vshrl.u32 %v1494_v39, 7 }
 0x1b9   : > { %v1470_v53 = vadd.f32 %v1469_v51, %v1407_v14  ;;  %v1338_v54 = vadd.f32 %v2561_v42, %v1337_v49  ;;  %v1412_v42 = vmul.f32 %v2581_v5, %v2581_v5  ;;  %vm1496_vm0 = vcmp.eq.s32.totalorder %v1495_v48, 0 }
 0x1bb   : > { %v1339_v55 = vadd.f32 %v1338_v54, %v2576_v62  ;;  %v1471_v56 = vadd.f32 %v1470_v53, %v1408_v21  ;;  %v1413_v62 = vmul.f32 %v2596_v24, %v2596_v24 }
 0x1bd   : > { %v1472_v61 = vadd.f32 %v1471_v56, %v1409_v36  ;;  %v1340_v46 = vadd.f32 %v1339_v55, %v2586_v7 }
 0x1bf   : > { %v1341_v2 = vadd.f32 %v2571_v59, %v1340_v46  ;;  %v1473_v4 = vadd.f32 %v1472_v61, %v1410_v0  ;;  %v1415_v59 = vmul.f32 %v2591_v20, %v2591_v20 }
 0x1c1   : > { %v1474_v6 = vadd.f32 %v1473_v4, %v1411_v34  ;;  %v1342_v8 = vadd.f32 %v2581_v5, %v1341_v2  ;;  %v1416_v5 = vmul.f32 %v2601_v29, %v2601_v29 }
 0x1c3   : > { %v1343_v43 = vadd.f32 %v1342_v8, %v2596_v24  ;;  %v1475_v9 = vadd.f32 %v1474_v6, %v1412_v42  ;;  %v1417_v24 = vmul.f32 %v2616_v52, %v2616_v52 }
 0x1c5   : > { %v1476_v10 = vadd.f32 %v1475_v9, %v1413_v62  ;;  %v1344_v7 = vadd.f32 %v1343_v43, %v2606_v31 }
 0x1c7   : > { %v1345_v47 = vadd.f32 %v2591_v20, %v1344_v7  ;;  %v1477_v12 = vadd.f32 %v1476_v10, %v1414_v11  ;;  %v1419_v20 = vmul.f32 %v2611_v50, %v2611_v50 }
 0x1c9   : > { %v1478_v41 = vadd.f32 %v1477_v12, %v1415_v59  ;;  %v1346_v13 = vadd.f32 %v2601_v29, %v1345_v47  ;;  %v1420_v29 = vmul.f32 %v2621_v57, %v2621_v57 }
 0x1cb   : > { %v1347_v17 = vadd.f32 %v1346_v13, %v2616_v52  ;;  %v1479_v45 = vadd.f32 %v1478_v41, %v1416_v5  ;;  %v1421_v52 = vmul.f32 %v2638_v18, %v2638_v18 }
 0x1cd   : > { %v1480_v19 = vadd.f32 %v1479_v45, %v1417_v24  ;;  %v1348_v31 = vadd.f32 %v1347_v17, %v2626_v63 }
 0x1cf   : > { %v1349_v60 = vadd.f32 %v2611_v50, %v1348_v31  ;;  %v1481_v25 = vadd.f32 %v1480_v19, %v1418_v22  ;;  %v1422_v50 = vmul.f32 %v2655_v30, %v2655_v30 }
 0x1d1   : > { %v1482_v26 = vadd.f32 %v1481_v25, %v1419_v20  ;;  %v1350_v28 = vadd.f32 %v2621_v57, %v1349_v60 }
 0x1d3   : > { %v1351_v3 = vadd.f32 %v1350_v28, %v2638_v18  ;;  %v1483_v32 = vadd.f32 %v1482_v26, %v1420_v29 }
 0x1d5   : > { %v1484_v63 = vadd.f32 %v1483_v32, %v1421_v52  ;;  %v1352_v58 = vadd.f32 %v1351_v3, %v2655_v30 }
 0x1d7   : > { %v1353_v35 = vadd.f32 %v2633_v15, %v1352_v58  ;;  %v1485_v57 = vadd.f32 %v1484_v63, %v1422_v50 }
 0x1d9   : > { %v1354_v18 = vadd.f32 %v2650_v27, %v1353_v35  ;;  %v1486_v37 = vadd.f32 %v1485_v57, %v1423_v33 }
 0x1db   : > { %v1355_v38 = vrot.slane %v1354_v18, 4  ;;  %v1487_v16 = vadd.f32 %v1486_v37, %v1424_v1 }
 0x1dd   : > { %v1356_v40 = vadd.f32 %v1355_v38, %v1354_v18  ;;  %v1488_v44 = vrot.slane %v1487_v16, 4 }
 0x1df   : > { %v1357_v30 = vrot.slane %v1356_v40, 2  ;;  %v1489_v23 = vadd.f32 %v1488_v44, %v1487_v16 }
 0x1e1   : > { %v1358_v14 = vadd.f32 %v1357_v30, %v1356_v40  ;;  %v1490_v15 = vrot.slane %v1489_v23, 2 }
 0x1e3   : > { %v1359_v49 = vrot.slane %v1358_v14, 1  ;;  %v1491_v51 = vadd.f32 %v1490_v15, %v1489_v23 }
 0x1e5   : > { %v1492_v27 = vrot.slane %v1491_v51, 1  ;;  %v1360_v21 = vadd.f32 %v1359_v49, %v1358_v14 }
 0x1e7   : > { %v1493_v53 = vadd.f32 %v1492_v27, %v1491_v51  ;;  %v1497_v54 = vsel %vm1496_vm0, %v1360_v21, 0.0 }
 0x1e8   : > { %1498 = vst [vmem:[%s280_s9] sm:$0xff] %v1497_v54 }
 0x1e9   : > { %v1499_v36 = vsel %vm1496_vm0, %v1493_v53, 0.0 }
 0x1ea   : > { %2146 = shalt.err (!%p2143_p3)
}
 0x1eb   : > { %s2147_s6 = scalar_lea.hbm %s2789_s22, 128  ;;  %s2151_s10 = scalar_lea.hbm %s2874_s3, 1024 }
 0x1ec   : > { %p2148_p7 = scmp.ne.s32.totalorder %s2789_s22, %s2147_s6  ;;  %p2152_p6 = scmp.lt.u32.totalorder %s2789_s22, %s2874_s3 }
 0x1ed   : > { %p2153_p8 = scmp.lt.u32.totalorder %s2151_s10, %s2147_s6  ;;  %p2155_p10 = scmp.lt.u32.totalorder %s2147_s6, %s2789_s22 }
 0x1ee   : > { %p2149_p13 = pnand %p2148_p7, %p2383_p11 }
 0x1ef   : > { %p2154_p12 = por %p2153_p8, %p2152_p6 }
 0x1f0   : > { %p2150_p4 = pneg %p2149_p13 }
 0x1f1   : > { %p2156_p0 = por %p2155_p10, %p2154_p12 }
 0x1f3   : > { %p2157_p5 = pnand %p2156_p0, %p2150_p4 }
 0x1f5   : > { %2160 = shalt.err (!%p2157_p5)
}
 0x1f6   : > { %1927 = dma.vmem_to_hbm [thread:$0]  (%p2383_p11), %s2791_s11, 128, %s2789_s22, %s2800_s25   ;;  %1500 = vst [vmem:[%s2783_s5] sm:$0xff] %v1499_v36 }
 0x1f7   : > { %s2161_s21 = scalar_lea.vmem %s2798_s26, 128  ;;  %s2261_s13 = smov [#allocation11]  }
 0x1f8   : > { %p2162_p9 = scmp.ne.s32.totalorder %s2798_s26, %s2161_s21  ;;  %s2165_s14 = sshll.u32 %s2261_s13, 4  ;;  %s2166_s14 = int_to_ptr.vmem [resolvable:$false] %s2165_s14 }
 0x1f9   : > { %s2167_s7 = scalar_lea.vmem %s2166_s14, 256  ;;  %p2168_p3 = scmp.lt.s32.totalorder %s2798_s26, %s2166_s14 }
 0x1fa   : > { %p2163_p1 = pnand %p2162_p9, %p2383_p11  ;;  %p2169_p7 = scmp.lt.s32.totalorder %s2167_s7, %s2161_s21 }
 0x1fc   : > { %p2164_p2 = pneg %p2163_p1  ;;  %p2170_p13 = por %p2169_p7, %p2168_p3 }
 0x1fe   : > { %p2171_p4 = pnand %p2170_p13, %p2164_p2 }
 0x200   : > { %2174 = shalt.err (!%p2171_p4)
}
 0x201   : > { %s2175_s11 = scalar_lea.hbm %s2796_s23, 128  ;;  %s2179_s12 = scalar_lea.hbm %s2875_s4, 1024 }
 0x202   : > { %p2176_p6 = scmp.ne.s32.totalorder %s2796_s23, %s2175_s11  ;;  %p2180_p10 = scmp.lt.u32.totalorder %s2796_s23, %s2875_s4 }
 0x203   : > { %p2181_p0 = scmp.lt.u32.totalorder %s2179_s12, %s2175_s11  ;;  %p2183_p9 = scmp.lt.u32.totalorder %s2175_s11, %s2796_s23 }
 0x204   : > { %p2177_p8 = pnand %p2176_p6, %p2383_p11 }
 0x205   : > { %p2182_p5 = por %p2181_p0, %p2180_p10 }
 0x206   : > { %p2178_p12 = pneg %p2177_p8 }
 0x207   : > { %p2184_p1 = por %p2183_p9, %p2182_p5 }
 0x209   : > { %p2185_p2 = pnand %p2184_p1, %p2178_p12 }
 0x20b   : > { %2188 = shalt.err (!%p2185_p2)
}
 0x20c   : > { %1928 = dma.vmem_to_hbm [thread:$0]  (%p2383_p11), %s2798_s26, 128, %s2796_s23, %s2800_s25  }
 0x20d PF: > { %p1953_p3 = scmp.ge.s32.totalorder %s2251_s20, 2  ;;  %s1569_s9 = sand.u32 1, %s2231_s15  }
 0x20e   : > { %p2892_p7 = scmp.ne.s32.totalorder %s2881_s24, 0  ;;  %s1570_s10 = scalar_lea.sflag [#allocation5], %s1569_s9 }
 0x210   : > { %p1941_p13 = pnand %p1953_p3, %p2892_p7 }
 0x212   : > { %2222 = dma.done.wait (!%p1941_p13), %s1570_s10, 8192  }
 0x213   : > { %2224 = vsyncadd (!%p1941_p13), %s1570_s10, 4294959104  ;;  %s2893_s27 = sadd.s32 4294967294, %s2251_s20  }
 0x214   : > { %s1578_s18 = sand.u32 1, %s2893_s27  }
 0x215   : > { %s1579_s21 = scalar_lea.sflag [#allocation10], %s1578_s18 }
 0x216   : > { %2226 = dma.done.wait (!%p1941_p13), %s1579_s21, 256  }
 0x217   : > { %2228 = vsyncadd (!%p1941_p13), %s1579_s21, 4294967040  ;;  %s25_s20 = sadd.s32 1, %s2251_s20   ;;  %s2894_s15 = smov %s2235_s16 }
 0x218   : > { %p22_p11 = scmp.ge.s32.totalorder %s25_s20, 10   ;;  %s2895_s16 = smov %s2239_s17 }
 0x219   : > { %s2896_s17 = smov %s2392_s8  ;;  %s2897_s18 = smov %s2247_s19 }
 0x21a   : > { %s2898_s19 = smov %s2900_s29  ;;  %24 = sbr.rel (!%p22_p11) target bundleno = 9 (0x9), region = 118 }
 0x221   :  { %1593 = vsyncpa [#allocation4], 1 }
 0x222   :  { %1595 = vsyncpa [#allocation4 + $0x1], 1 }
 0x223   :  { %1596 = vsyncpa [#allocation7], 1 }
 0x224   :  { %1597 = vsyncpa [#allocation5], 1 }
 0x225   :  { %1599 = vsyncpa [#allocation5 + $0x1], 1 }
 0x226   :  { %1600 = vsyncpa [#allocation10], 1 }
 0x227   :  { %1602 = vsyncpa [#allocation10 + $0x1], 1 }

</bundles_post_ra>
